<compile_context>
chip_gen: v5e
topology: v5e:2x2
jax: 0.10.0
libtpu: 0.0.40
codegen_flags: <defaults>
</compile_context>

<pallas_src>
import functools

import jax
import jax.numpy as jnp
from jax.experimental import pallas as pl
from jax.experimental.pallas import tpu as pltpu

EPS = 1e-5
_VMEM_LIMIT_BYTES = 48 << 20          # explicit scoped-VMEM limit (safe on v5e/v6e/v7x)
_DEFAULT_BLOCK_BUDGET = 4 << 20       # ~4 MiB per x block -> ~16 MiB of pipeline buffers


# ---------------------------------------------------------------------------
# Tile planning
# ---------------------------------------------------------------------------
def _legal_tiles(dim, step):
    """Legal tile sizes for a (sub)lane-constrained dim: the full dim, plus any
    multiple of `step` that divides it exactly. Returned descending."""
    opts = {dim}
    if dim % step == 0:
        opts.update(d for d in range(step, dim + 1, step) if dim % d == 0)
    return sorted(opts, reverse=True)


def _plan_tiles(N, C, L, itemsize, budget):
    """Return ('fused', tc) or ('two_phase', tn, tc, tl).

    Fused is preferred (2 HBM passes instead of 3): it only needs SOME legal
    channel tile tc such that the (N, tc, L) slab fits the block budget.
    """
    c_tiles = _legal_tiles(C, 8)       # descending, full C first
    l_tiles = _legal_tiles(L, 128)     # descending, full L first

    # --- fused: whole (N, tc, L) channel slab resident -> reduce + scale ----
    fused_tc = next((tc for tc in c_tiles if N * tc * L * itemsize <= budget), None)
    if fused_tc is not None:
        # If everything landed in a single grid step and the array is large
        # enough to care, split the channel axis once so both TensorCores get
        # work on megacore parts (still one HBM read + one write per element).
        if fused_tc == C and N * C * L * itemsize > (1 << 20):
            split = next((tc for tc in c_tiles if C // tc >= 2), None)
            if split is not None:
                fused_tc = split
        return ("fused", fused_tc)

    # --- two-phase: reduce (read) then scale (read + write) -----------------
    min_tc = c_tiles[-1]               # smallest legal channel tile (8 or C)
    # Largest lane tile that fits with (tn=1, tc=min_tc): long contiguous DMAs.
    tl = next((t for t in l_tiles if min_tc * t * itemsize <= budget), l_tiles[-1])
    # Largest channel tile that fits; prefer one keeping >=2 channel blocks so
    # the "parallel" channel axis can be split across cores.
    fitting = [tc for tc in c_tiles if tc * tl * itemsize <= budget] or [min_tc]
    tc = next((t for t in fitting if C // t >= 2), fitting[0])
    # Largest batch tile (divisor of N) that still fits the budget.
    tn = next((d for d in range(N, 0, -1)
               if N % d == 0 and d * tc * tl * itemsize <= budget), 1)
    return ("two_phase", tn, tc, tl)


# ---------------------------------------------------------------------------
# Kernels
# ---------------------------------------------------------------------------
def _qbn_fused_kernel(x_ref, o_ref, *, eps, inv_count):
    """Single pass: whole (N, tc, L) slab resident -> reduce + scale."""
    x = x_ref[...]                                               # (N, tc, L)
    xf = x.astype(jnp.float32)
    ssq = jnp.sum(xf * xf, axis=(0, 2), keepdims=True)           # (1, tc, 1) f32
    inv = jax.lax.rsqrt(ssq * inv_count + eps)                   # 1/sqrt(mean2 + eps)
    o_ref[...] = (x * inv.astype(x.dtype)).astype(o_ref.dtype)   # multiply in input dtype


def _qbn_sumsq_kernel(x_ref, inv_ref, acc_ref, *, eps, inv_count):
    """Phase 1: accumulate per-channel sum of squares; finalize to 1/sqrt(mean2+eps)."""
    ni = pl.program_id(1)
    li = pl.program_id(2)

    @pl.when(jnp.logical_and(ni == 0, li == 0))
    def _init():
        acc_ref[...] = jnp.zeros_like(acc_ref)

    xf = x_ref[...].astype(jnp.float32)                          # (tn, tc, tl)
    ssq = jnp.sum(xf * xf, axis=(0, 2), keepdims=True)           # (1, tc, 1)
    acc_ref[...] += ssq[0]                                       # (tc, 1) running sum

    @pl.when(jnp.logical_and(ni == pl.num_programs(1) - 1,
                             li == pl.num_programs(2) - 1))
    def _finalize():
        # Divide by the true element count once at finalize (not per tile).
        inv_ref[...] = jax.lax.rsqrt(acc_ref[...] * inv_count + eps)


def _qbn_scale_kernel(x_ref, inv_ref, o_ref):
    """Phase 2: y = x * inv[c], broadcast per channel, computed in input dtype."""
    x = x_ref[...]                                               # (tn, tc, tl)
    inv = inv_ref[...].astype(x.dtype)                           # (tc, 1)
    o_ref[...] = (x * inv[None, :, :]).astype(o_ref.dtype)


# ---------------------------------------------------------------------------
# Wrapper
# ---------------------------------------------------------------------------
def qbn_rm1d(x, eps=EPS, block_budget_bytes=_DEFAULT_BLOCK_BUDGET):
    """x: (N, C, L) -> (N, C, L); per-channel RMS normalization (QBN_RM1d.forward)."""
    N, C, L = x.shape
    itemsize = jnp.dtype(x.dtype).itemsize
    inv_count = 1.0 / float(N * L)
    plan = _plan_tiles(N, C, L, itemsize, block_budget_bytes)

    if plan[0] == "fused":
        tc = plan[1]
        grid_c = C // tc
        # Fused single-pass path: 2 HBM passes, channel axis tiled + parallel.
        return pl.pallas_call(
            functools.partial(_qbn_fused_kernel, eps=eps, inv_count=inv_count),
            out_shape=jax.ShapeDtypeStruct((N, C, L), x.dtype),
            grid=(grid_c,),
            in_specs=[pl.BlockSpec((N, tc, L), lambda ci: (0, ci, 0))],
            out_specs=pl.BlockSpec((N, tc, L), lambda ci: (0, ci, 0)),
            compiler_params=pltpu.CompilerParams(
                dimension_semantics=("parallel",),
                vmem_limit_bytes=_VMEM_LIMIT_BYTES),
        )(x)

    _, tn, tc, tl = plan
    grid_c, grid_n, grid_l = C // tc, N // tn, L // tl

    # Phase 1: per-channel inverse coefficient, shape (C, 1) f32.
    # Reduction axes (batch, length) are trailing "arbitrary"; output block
    # index is constant across them -> acts as a resident accumulator target.
    inv = pl.pallas_call(
        functools.partial(_qbn_sumsq_kernel, eps=eps, inv_count=inv_count),
        out_shape=jax.ShapeDtypeStruct((C, 1), jnp.float32),
        grid=(grid_c, grid_n, grid_l),
        in_specs=[pl.BlockSpec((tn, tc, tl), lambda ci, ni, li: (ni, ci, li))],
        out_specs=pl.BlockSpec((tc, 1), lambda ci, ni, li: (ci, 0)),
        scratch_shapes=[pltpu.VMEM((tc, 1), jnp.float32)],
        compiler_params=pltpu.CompilerParams(
            dimension_semantics=("parallel", "arbitrary", "arbitrary"),
            vmem_limit_bytes=_VMEM_LIMIT_BYTES),
    )(x)

    # Phase 2: normalize; every tile independent -> fully parallel grid.
    return pl.pallas_call(
        _qbn_scale_kernel,
        out_shape=jax.ShapeDtypeStruct((N, C, L), x.dtype),
        grid=(grid_c, grid_n, grid_l),
        in_specs=[pl.BlockSpec((tn, tc, tl), lambda ci, ni, li: (ni, ci, li)),
                  pl.BlockSpec((tc, 1), lambda ci, ni, li: (ci, 0))],
        out_specs=pl.BlockSpec((tn, tc, tl), lambda ci, ni, li: (ni, ci, li)),
        compiler_params=pltpu.CompilerParams(
            dimension_semantics=("parallel", "parallel", "parallel"),
            vmem_limit_bytes=_VMEM_LIMIT_BYTES),
    )(x, inv)


# ---------------------------------------------------------------------------
# Reference + test
# ---------------------------------------------------------------------------
def qbn_rm1d_reference(x, eps=EPS):
    N, C, L = x.shape
    mean2 = jnp.mean(
        (x.astype(jnp.float32) ** 2).transpose(1, 0, 2).reshape(C, -1), axis=1)
    coef = jnp.sqrt(mean2 + eps).reshape(1, C, 1)
    return (x / coef).astype(x.dtype)


if __name__ == "__main__":
    key = jax.random.PRNGKey(0)

    # Small shape consistent with the module (batch divisible by 3, as the
    # original forward computes inSize[0] // 3 — dead code, but kept in spirit).
    N, C, L = 6, 4, 16
    x = jax.random.normal(key, (N, C, L), dtype=jnp.float32)
    y = qbn_rm1d(x)                                   # fused single-pass path
    jax.block_until_ready(y)
    assert y.shape == (N, C, L)
    assert jnp.allclose(y, qbn_rm1d_reference(x), atol=1e-5, rtol=1e-5)

    # Also exercise the tiled two-phase (accumulate + normalize) path by
    # forcing a tiny per-block VMEM budget.
    N2, C2, L2 = 6, 8, 256
    x2 = jax.random.normal(jax.random.PRNGKey(0), (N2, C2, L2), dtype=jnp.float32)
    y2 = qbn_rm1d(x2, block_budget_bytes=4096)
    jax.block_until_ready(y2)
    assert y2.shape == (N2, C2, L2)
    assert jnp.allclose(y2, qbn_rm1d_reference(x2), atol=1e-5, rtol=1e-5)

    print("KERNEL_OK")
</pallas_src>

<mosaic_0001>
module attributes {stable_mosaic.version = 11 : i64} {
  func.func @_qbn_fused_kernel(%arg0: i32, %arg1: memref<6x4x16xf32, #tpu.memory_space<vmem>>, %arg2: memref<6x4x16xf32, #tpu.memory_space<vmem>>) attributes {dimension_semantics = [#tpu.dimension_semantics<parallel>], iteration_bounds = array<i64: 1>, scalar_prefetch = 0 : i64, scratch_operands = 0 : i64, tpu.core_type = #tpu.core_type<tc>, window_params = [{transform_indices = @transform_0, window_bounds = array<i64: 6, 4, 16>}, {transform_indices = @transform_1, window_bounds = array<i64: 6, 4, 16>}]} {
    %c0 = arith.constant 0 : index
    %c0_0 = arith.constant 0 : index
    %c0_1 = arith.constant 0 : index
    %0 = vector.load %arg1[%c0, %c0_0, %c0_1] : memref<6x4x16xf32, #tpu.memory_space<vmem>>, vector<6x4x16xf32>
    %1 = arith.mulf %0, %0 : vector<6x4x16xf32>
    %cst = arith.constant dense<0.000000e+00> : vector<4xf32>
    %2 = vector.multi_reduction <add>, %1, %cst [0, 2] : vector<6x4x16xf32> to vector<4xf32>
    %3 = vector.shape_cast %2 : vector<4xf32> to vector<1x4x1xf32>
    %cst_2 = arith.constant 0.010416667 : f32
    %4 = vector.broadcast %cst_2 : f32 to vector<1x4x1xf32>
    %5 = arith.mulf %3, %4 : vector<1x4x1xf32>
    %cst_3 = arith.constant 9.99999974E-6 : f32
    %6 = vector.broadcast %cst_3 : f32 to vector<1x4x1xf32>
    %7 = arith.addf %5, %6 : vector<1x4x1xf32>
    %8 = math.rsqrt %7 : vector<1x4x1xf32>
    %9 = vector.broadcast %8 : vector<1x4x1xf32> to vector<6x4x16xf32>
    %10 = arith.mulf %0, %9 : vector<6x4x16xf32>
    %c0_4 = arith.constant 0 : index
    %c0_5 = arith.constant 0 : index
    %c0_6 = arith.constant 0 : index
    %11 = vector.load %arg2[%c0_4, %c0_5, %c0_6] : memref<6x4x16xf32, #tpu.memory_space<vmem>>, vector<6x4x16xf32>
    tpu.vector_store %arg2[%c0_4, %c0_5, %c0_6], %10 {strides = array<i32>} : memref<6x4x16xf32, #tpu.memory_space<vmem>>, vector<6x4x16xf32>,
    return
  }
  func.func @transform_0(%arg0: i32) -> (i32, i32, i32) {
    %c0_i32 = arith.constant 0 : i32
    %c0_i32_0 = arith.constant 0 : i32
    %c0_i32_1 = arith.constant 0 : i32
    return %c0_i32, %arg0, %c0_i32_0 : i32, i32, i32
  }
  func.func @transform_1(%arg0: i32) -> (i32, i32, i32) {
    %c0_i32 = arith.constant 0 : i32
    %c0_i32_0 = arith.constant 0 : i32
    %c0_i32_1 = arith.constant 0 : i32
    return %c0_i32, %arg0, %c0_i32_0 : i32, i32, i32
  }
}

</mosaic_0001>

<bundles_post_ra>
// kernel: tpu_custom_call.1
= control target key start
LH: loop header
LB: loop body
LE: loop exit
PB: predicated region body
PF: predicated region fallthrough
CT: control target
= control target key end

     0   :  { %6 = vsyncpa [#allocation3], 0  ;;  %s190_s0 = inlined_call_operand.hbm [shape: f32[6,4,16], index: 0, kind: input, shape index: {}]   ;;  %s191_s1 = inlined_call_operand.hbm [shape: f32[6,4,16], index: 1, kind: output, shape index: {}]  }
   0x1   :  { %7 = vsyncpa [#allocation4], 0  ;;  %s12_s8 = sshll.u32 %s190_s0, 4  ;;  %s152_s9 = smov [#allocation2]   ;;  %s13_s8 = int_to_ptr.hbm [resolvable:$true] %s12_s8 }
   0x2   :  { %s14_s10 = sshll.u32 %s152_s9, 4  ;;  %s153_s11 = smov 64   ;;  %s15_s10 = int_to_ptr.vmem [resolvable:$true] %s14_s10 }
   0x3   :  { %s154_s12 = smov 4  }
   0x4   :  { %20 = dma.hbm_to_vmem [thread:$0]  %s13_s8, 384, %s15_s10, [#allocation3], %s153_s11, %s153_s11, %s154_s12  }
   0x5   :  { %148 = dma.done.wait [#allocation3], 384  }
   0x6   :  { %149 = vsyncadd [#allocation3], 4294966912  ;;  %vm37_vm0 = vcmask 125952   ;;  %v25_v0 = vld [vmem:[#allocation2] sm:$0xf]  ;;  %s155_s0 = smov [#allocation5]  }
   0x7   :  { %v26_v1 = vld [vmem:[#allocation2 + $0x4] sm:$0xf]  ;;  %v27_v2 = vld [vmem:[#allocation2 + $0x8] sm:$0xf]  ;;  %v28_v3 = vld [vmem:[#allocation2 + $0xc] sm:$0xf]  ;;  %v31_v5 = vmul.f32 %v25_v0, %v25_v0 }
   0x8   :  { %v29_v4 = vld [vmem:[#allocation2 + $0x10] sm:$0xf]  ;;  %v32_v6 = vmul.f32 %v26_v1, %v26_v1  ;;  %v33_v7 = vmul.f32 %v27_v2, %v27_v2  ;;  %v30_v8 = vld [vmem:[#allocation2 + $0x14] sm:$0xf]  ;;  %v34_v9 = vmul.f32 %v28_v3, %v28_v3  ;;  %s79_s13 = sshll.u32 %s155_s0, 4  ;;  %s81_s16 = sshll.u32 %s191_s1, 4  ;;  %s80_s13 = int_to_ptr.vmem [resolvable:$true] %s79_s13  ;;  %s82_s16 = int_to_ptr.hbm [resolvable:$true] %s81_s16 }
   0x9   :  { %v35_v10 = vmul.f32 %v29_v4, %v29_v4  ;;  %v38_v11 = vsel %vm37_vm0, %v31_v5, 0.0  ;;  %v36_v15 = vmul.f32 %v30_v8, %v30_v8 }
   0xa   :  { %v39_v12 = vsel %vm37_vm0, %v32_v6, 0.0  ;;  %v41_v13 = vsel %vm37_vm0, %v33_v7, 0.0  ;;  %v43_v16 = vsel %vm37_vm0, %v34_v9, 0.0 }
   0xb   :  { %v40_v14 = vadd.f32 %v39_v12, %v38_v11  ;;  %v45_v18 = vsel %vm37_vm0, %v35_v10, 0.0  ;;  %v47_v20 = vsel %vm37_vm0, %v36_v15, 0.0 }
   0xd   :  { %v42_v17 = vadd.f32 %v41_v13, %v40_v14 }
   0xf   :  { %v44_v19 = vadd.f32 %v43_v16, %v42_v17 }
  0x11   :  { %v46_v21 = vadd.f32 %v45_v18, %v44_v19 }
  0x13   :  { %v48_v22 = vadd.f32 %v47_v20, %v46_v21 }
  0x15   :  { %49 = vadd.xlane.f32.xlu0 %v48_v22 }
  0x88   :  { %v50_v23 = vpop.xlane.xlu0 %49 }
  0x89   :  { %v51_v24 = vmul.f32 0.010416667, %v50_v23 }
  0x8b   :  { %v52_v25 = vadd.f32 1e-05, %v51_v24 }
  0x8d   :  { %98 = vrsqrt.f32 %v52_v25  ;;  %vm59_vm2 = vweird.f32 %v52_v25 }
  0x93   :  { %v99_v26 = vpop.eup %98 }
  0x94   :  { %v54_v27 = vmul.f32 %v99_v26, %v52_v25  ;;  %vm60_vm1 = vweird.f32 %v99_v26 }
  0x95   :  { %vm61_vm3 = vmor %vm59_vm2, %vm60_vm1 }
  0x96   :  { %v55_v28 = vmul.f32 %v99_v26, %v54_v27 }
  0x98   :  { %v56_v29 = vmul.f32 0.5, %v55_v28 }
  0x9a   :  { %v57_v30 = vsub.f32 1.5, %v56_v29 }
  0x9c   :  { %v58_v31 = vmul.f32 %v99_v26, %v57_v30 }
  0x9e   :  { %v62_v32 = vsel %vm61_vm3, %v99_v26, %v58_v31 }
  0x9f   :  { %v63_v33 = vmul.f32 %v62_v32, %v25_v0  ;;  %v64_v34 = vmul.f32 %v62_v32, %v26_v1  ;;  %v65_v35 = vmul.f32 %v62_v32, %v27_v2  ;;  %v66_v36 = vmul.f32 %v62_v32, %v28_v3 }
  0xa0   :  { %v67_v37 = vmul.f32 %v62_v32, %v29_v4  ;;  %v68_v38 = vmul.f32 %v62_v32, %v30_v8 }
  0xa1   :  { %69 = vst.msk [vmem:[#allocation5] sm:$0xf] %vm37_vm0, %v63_v33 }
  0xa2   :  { %70 = vst.msk [vmem:[#allocation5 + $0x4] sm:$0xf] %vm37_vm0, %v64_v34 }
  0xa3   :  { %71 = vst.msk [vmem:[#allocation5 + $0x8] sm:$0xf] %vm37_vm0, %v65_v35 }
  0xa4   :  { %72 = vst.msk [vmem:[#allocation5 + $0xc] sm:$0xf] %vm37_vm0, %v66_v36 }
  0xa5   :  { %73 = vst.msk [vmem:[#allocation5 + $0x10] sm:$0xf] %vm37_vm0, %v67_v37 }
  0xa6   :  { %74 = vst.msk [vmem:[#allocation5 + $0x14] sm:$0xf] %vm37_vm0, %v68_v38 }
  0xa7   :  { %87 = dma.vmem_to_hbm [thread:$0]  %s80_s13, 384, %s82_s16, [#allocation4], %s153_s11, %s153_s11, %s154_s12  }
  0xa8   :  { %150 = dma.done.wait [#allocation4], 384  }
  0xa9   :  { %151 = vsyncadd [#allocation4], 4294966912 }
  0xaa   :  { %92 = vsyncpa [#allocation3], 1 }
  0xab   :  { %93 = vsyncpa [#allocation4], 1 }

</bundles_post_ra>
